<compile_context>
chip_gen: v7x
topology: tpu7x:2x2x1
jax: 0.10.0
libtpu: 0.0.40
codegen_flags: <defaults>
</compile_context>

<pallas_src>
import functools

import jax
import jax.numpy as jnp
from jax.experimental import pallas as pl
from jax.experimental.pallas import tpu as pltpu


def _round_up(x, m):
    return ((x + m - 1) // m) * m


def _dim_reduce_kernel(x_ref, w_ref, ss_ref, o_ref):
    """One grid step: full-K matmul tile with fused BN(+bias) + ReLU epilogue."""
    acc = jnp.dot(x_ref[...], w_ref[...], preferred_element_type=jnp.float32)
    scale = ss_ref[0:1, :]   # (1, tn)
    shift = ss_ref[1:2, :]   # (1, tn)
    o_ref[...] = jnp.maximum(acc * scale + shift, 0.0).astype(o_ref.dtype)


@functools.partial(jax.jit, static_argnames=("tm", "tn", "out_n"))
def _dim_reduce_2d(x2d, w_pad, ss_pad, *, tm, tn, out_n):
    """x2d: (M, K) f32 unpadded; w_pad: (K_pad, N_pad) bf16; ss_pad: (2, N_pad) f32."""
    M, K = x2d.shape
    K_pad, N_pad = w_pad.shape
    M_pad = _round_up(max(M, 1), tm)

    # Zero-pad rows (M) and reduction dim (K); zeros contribute nothing to the dot.
    x_p = jnp.pad(x2d, ((0, M_pad - M), (0, K_pad - K))).astype(jnp.bfloat16)

    grid = (N_pad // tn, M_pad // tm)   # N-blocks outer -> W slab resident over M loop

    y = pl.pallas_call(
        _dim_reduce_kernel,
        out_shape=jax.ShapeDtypeStruct((M_pad, N_pad), jnp.float32),
        grid_spec=pltpu.PrefetchScalarGridSpec(
            num_scalar_prefetch=0,
            grid=grid,
            in_specs=[
                pl.BlockSpec((tm, K_pad), lambda j, i: (i, 0)),   # x rows, full K
                pl.BlockSpec((K_pad, tn), lambda j, i: (0, j)),   # W column slab (VMEM resident)
                pl.BlockSpec((2, tn), lambda j, i: (0, j)),       # folded BN scale/shift
            ],
            out_specs=pl.BlockSpec((tm, tn), lambda j, i: (i, j)),
        ),
        compiler_params=pltpu.CompilerParams(
            dimension_semantics=("parallel", "parallel"),
            vmem_limit_bytes=48 * 1024 * 1024,   # safe on v7x (64 MiB physical) too
        ),
    )(x_p, w_pad, ss_pad)

    return y[:M, :out_n]


class AfterPoolingDimReduceLayerPallas:
    """JAX/Pallas equivalent of torchreid's AfterPoolingDimReduceLayer (eval mode)."""

    # Weight slabs up to this many bytes stay fully VMEM-resident (single N block).
    _W_VMEM_BUDGET = 8 * 1024 * 1024

    def __init__(self, input_dim, output_dim, dropout_p=None, *, key=None):
        if key is None:
            key = jax.random.PRNGKey(0)
        # nn.Linear init: weight ~ N(0, 0.01), bias = 0
        self.weight = 0.01 * jax.random.normal(
            key, (output_dim, input_dim), dtype=jnp.float32
        )
        self.bias = jnp.zeros((output_dim,), dtype=jnp.float32)
        # nn.BatchNorm1d init: gamma=1, beta=0, running_mean=0, running_var=1
        self.gamma = jnp.ones((output_dim,), dtype=jnp.float32)
        self.beta = jnp.zeros((output_dim,), dtype=jnp.float32)
        self.running_mean = jnp.zeros((output_dim,), dtype=jnp.float32)
        self.running_var = jnp.ones((output_dim,), dtype=jnp.float32)
        self.eps = 1e-5
        self.dropout_p = dropout_p  # identity in eval mode

        self.input_dim = input_dim
        self.output_dim = output_dim
        self._prepare_folded_params()

    def _prepare_folded_params(self):
        """Fold Linear bias + BN (inference) into per-channel scale/shift and pad."""
        inv_std = 1.0 / jnp.sqrt(self.running_var + self.eps)
        scale = self.gamma * inv_std                                    # (D_out,)
        shift = (self.bias - self.running_mean) * scale + self.beta     # (D_out,)

        K, N = self.input_dim, self.output_dim
        K_pad = _round_up(K, 128)
        n128 = _round_up(N, 128)
        if K_pad * n128 * 2 <= self._W_VMEM_BUDGET:      # bf16 bytes
            tn = n128                                    # whole W resident, 1-D grid over M
        else:
            tn = 512                                     # tile N; W slab still K-resident
        N_pad = _round_up(N, tn)

        w_t = self.weight.T                                             # (D_in, D_out)
        self._tn = tn
        self._w_pad = jnp.pad(
            w_t, ((0, K_pad - K), (0, N_pad - N))
        ).astype(jnp.bfloat16)                                          # (K_pad, N_pad)
        self._ss_pad = jnp.pad(
            jnp.stack([scale, shift], axis=0), ((0, 0), (0, N_pad - N))
        ).astype(jnp.float32)                                           # (2, N_pad)

    @staticmethod
    def _pick_tm(M):
        if M >= 256:
            return 256
        return max(16, _round_up(M, 16))

    def _forward_2d(self, x2d):
        tm = self._pick_tm(x2d.shape[0])
        return _dim_reduce_2d(
            x2d, self._w_pad, self._ss_pad, tm=tm, tn=self._tn, out_n=self.output_dim
        )

    def __call__(self, x):
        if x.ndim == 3:
            N, P, _ = x.shape
            y = self._forward_2d(x.reshape(N * P, -1))
            return y.reshape(N, P, -1)
        return self._forward_2d(x)


if __name__ == "__main__":
    key = jax.random.PRNGKey(0)
    k_param, k_x3, k_x2 = jax.random.split(key, 3)

    # Non-multiples of 8/128 to exercise the padding paths.
    input_dim, output_dim = 192, 96
    layer = AfterPoolingDimReduceLayerPallas(input_dim, output_dim, key=k_param)

    # 3-D path: (N parts-batch, P parts, input_dim)
    x3 = jax.random.normal(k_x3, (2, 7, input_dim), dtype=jnp.float32)
    y3 = layer(x3)
    jax.block_until_ready(y3)
    assert y3.shape == (2, 7, output_dim)

    # 2-D path: (batch, input_dim)
    x2 = jax.random.normal(k_x2, (13, input_dim), dtype=jnp.float32)
    y2 = layer(x2)
    jax.block_until_ready(y2)
    assert y2.shape == (13, output_dim)

    # Pure-JAX f32 reference (same folded-BN inference semantics).
    def ref(x2d):
        lin = x2d @ layer.weight.T + layer.bias
        bn = (lin - layer.running_mean) / jnp.sqrt(layer.running_var + layer.eps)
        bn = bn * layer.gamma + layer.beta
        return jnp.maximum(bn, 0.0)

    # bf16 operands with f32 accumulation -> loosened tolerance vs f32 reference.
    assert jnp.allclose(y2, ref(x2), atol=1e-2, rtol=1e-2)
    assert jnp.allclose(
        y3.reshape(2 * 7, -1), ref(x3.reshape(2 * 7, -1)), atol=1e-2, rtol=1e-2
    )

    print("KERNEL_OK")
</pallas_src>

<mosaic_0001>
module attributes {stable_mosaic.version = 11 : i64} {
  func.func @_dim_reduce_kernel(%arg0: i32, %arg1: i32, %arg2: memref<16x256xbf16, #tpu.memory_space<vmem>>, %arg3: memref<256x128xbf16, #tpu.memory_space<vmem>>, %arg4: memref<2x128xf32, #tpu.memory_space<vmem>>, %arg5: memref<16x128xf32, #tpu.memory_space<vmem>>) attributes {dimension_semantics = [#tpu.dimension_semantics<parallel>, #tpu.dimension_semantics<parallel>], iteration_bounds = array<i64: 1, 1>, scalar_prefetch = 0 : i64, scratch_operands = 0 : i64, tpu.core_type = #tpu.core_type<tc>, window_params = [{transform_indices = @transform_0, window_bounds = array<i64: 16, 256>}, {transform_indices = @transform_1, window_bounds = array<i64: 256, 128>}, {transform_indices = @transform_2, window_bounds = array<i64: 2, 128>}, {transform_indices = @transform_3, window_bounds = array<i64: 16, 128>}]} {
    %c0 = arith.constant 0 : index
    %c0_0 = arith.constant 0 : index
    %0 = vector.load %arg2[%c0, %c0_0] : memref<16x256xbf16, #tpu.memory_space<vmem>>, vector<16x256xbf16>
    %c0_1 = arith.constant 0 : index
    %c0_2 = arith.constant 0 : index
    %1 = vector.load %arg3[%c0_1, %c0_2] : memref<256x128xbf16, #tpu.memory_space<vmem>>, vector<256x128xbf16>
    %cst = arith.constant dense<0.000000e+00> : vector<16x128xf32>
    %2 = tpu.matmul %0, %1, %cst {dimension_numbers = #tpu.dot_dimension_numbers<[1], [0], [0], [1], [0, 0, 1, 1], [], []>} : vector<16x256xbf16>, vector<256x128xbf16>, vector<16x128xf32> -> vector<16x128xf32>
    %c0_3 = arith.constant 0 : index
    %c0_4 = arith.constant 0 : index
    %3 = vector.load %arg4[%c0_3, %c0_4] : memref<2x128xf32, #tpu.memory_space<vmem>>, vector<1x128xf32>
    %c1 = arith.constant 1 : index
    %c0_5 = arith.constant 0 : index
    %4 = vector.load %arg4[%c1, %c0_5] : memref<2x128xf32, #tpu.memory_space<vmem>>, vector<1x128xf32>
    %5 = vector.broadcast %3 : vector<1x128xf32> to vector<16x128xf32>
    %6 = arith.mulf %2, %5 : vector<16x128xf32>
    %7 = vector.broadcast %4 : vector<1x128xf32> to vector<16x128xf32>
    %8 = arith.addf %6, %7 : vector<16x128xf32>
    %cst_6 = arith.constant 0.000000e+00 : f32
    %9 = vector.broadcast %cst_6 : f32 to vector<16x128xf32>
    %10 = arith.maximumf %8, %9 : vector<16x128xf32>
    %c0_7 = arith.constant 0 : index
    %c0_8 = arith.constant 0 : index
    %11 = vector.load %arg5[%c0_7, %c0_8] : memref<16x128xf32, #tpu.memory_space<vmem>>, vector<16x128xf32>
    tpu.vector_store %arg5[%c0_7, %c0_8], %10 {strides = array<i32>} : memref<16x128xf32, #tpu.memory_space<vmem>>, vector<16x128xf32>,
    return
  }
  func.func @transform_0(%arg0: i32, %arg1: i32) -> (i32, i32) {
    %c0_i32 = arith.constant 0 : i32
    %c0_i32_0 = arith.constant 0 : i32
    return %arg1, %c0_i32 : i32, i32
  }
  func.func @transform_1(%arg0: i32, %arg1: i32) -> (i32, i32) {
    %c0_i32 = arith.constant 0 : i32
    %c0_i32_0 = arith.constant 0 : i32
    return %c0_i32, %arg0 : i32, i32
  }
  func.func @transform_2(%arg0: i32, %arg1: i32) -> (i32, i32) {
    %c0_i32 = arith.constant 0 : i32
    %c0_i32_0 = arith.constant 0 : i32
    return %c0_i32, %arg0 : i32, i32
  }
  func.func @transform_3(%arg0: i32, %arg1: i32) -> (i32, i32) {
    %c0_i32 = arith.constant 0 : i32
    return %arg1, %arg0 : i32, i32
  }
}

</mosaic_0001>

<bundles_post_ra>
// kernel: _dim_reduce_2d.1
= control target key start
LH: loop header
LB: loop body
LE: loop exit
PB: predicated region body
PF: predicated region fallthrough
CT: control target
= control target key end

     0   :  { %8 = vsyncpa [#allocation3], 0  ;;  %s423_s0 = inlined_call_operand.vmem [shape: bf16[16,256], index: 0, kind: input, shape index: {}]   ;;  %s424_s1 = inlined_call_operand.hbm [shape: bf16[256,128], index: 1, kind: input, shape index: {}]   ;;  %s425_s2 = inlined_call_operand.vmem [shape: f32[2,128], index: 2, kind: input, shape index: {}]   ;;  %s426_s3 = inlined_call_operand.hbm [shape: f32[16,128], index: 3, kind: output, shape index: {}]  }
   0x1   :  { %9 = vsyncpa [#allocation4], 0  ;;  %s361_s12 = smov [#allocation2]   ;;  %s313_s16 = scalar_lea.hbm %s424_s1, 2048 }
   0x2   :  { %s17_s13 = sshll.u32 %s361_s12, 4  ;;  %p314_p0 = scmp.ne.s32.totalorder %s424_s1, %s313_s16  ;;  %s18_s13 = int_to_ptr.vmem [resolvable:$true] %s17_s13 }
   0x3   :  { %p317_p1 = scmp.lt.u32.totalorder %s313_s16, %s424_s1 }
   0x5   :  { %p319_p2 = pnand %p317_p1, %p314_p0 }
   0x7   :  { %322 = shalt.err (!%p319_p2)
}
   0x8   :  { %s323_s21 = scalar_lea.vmem %s18_s13, 2048  ;;  %p328_p4 = scmp.lt.s32.totalorder %s18_s13, %s18_s13 }
   0x9   :  { %p324_p3 = scmp.ne.s32.totalorder %s18_s13, %s323_s21  ;;  %p329_p5 = scmp.lt.s32.totalorder %s323_s21, %s323_s21 }
   0xb   :  { %p330_p6 = por %p329_p5, %p328_p4 }
   0xd   :  { %p331_p7 = pnand %p330_p6, %p324_p3 }
   0xf   :  { %334 = shalt.err (!%p331_p7)
}
  0x10   :  { %s362_s22 = smov 64   ;;  %s363_s23 = smov 4  }
  0x11   :  { %23 = dma.hbm_to_vmem [thread:$0]  %s424_s1, 2048, %s18_s13, [#allocation3], %s362_s22, %s362_s22, %s363_s23  }
  0x12   :  { %357 = dma.done.wait [#allocation3], 2048  }
  0x13   :  { %358 = vsyncadd [#allocation3], 4294965248  ;;  %v294_v0 = vld [vmem:[#allocation2 + $0x40] sm:$0xff]   ;;  %v296_v2 = vld [vmem:[#allocation2 + $0x48] sm:$0xff]  }
  0x14   :  { %v295_v1 = vld [vmem:[#allocation2] sm:$0xff]   ;;  %266 = vmatprep.subr.bf16.mxu0 %v294_v0  ;;  %v297_v3 = vld [vmem:[#allocation2 + $0x8] sm:$0xff]   ;;  %v298_v4 = vld [vmem:[#allocation2 + $0x50] sm:$0xff]  }
  0x15   :  { %267 = vmatpush3.bf16.msra.mxu0 %v295_v1  ;;  %v299_v5 = vld [vmem:[#allocation2 + $0x10] sm:$0xff]   ;;  %v300_v6 = vld [vmem:[#allocation2 + $0x58] sm:$0xff]   ;;  %v302_v8 = vld [vmem:[#allocation2 + $0x60] sm:$0xff]  }
  0x16   :  { %268 = vmatprep.subr.bf16.mxu0 %v296_v2  ;;  %v301_v7 = vld [vmem:[#allocation2 + $0x18] sm:$0xff]   ;;  %v303_v9 = vld [vmem:[#allocation2 + $0x20] sm:$0xff]   ;;  %v304_v10 = vld [vmem:[#allocation2 + $0x68] sm:$0xff]  }
  0x17   :  { %v312_v11 = vld [vmem:[%s423_s0 + $0x4] ss:$8 sps:$4 sm:$0xff]   ;;  %v306_v13 = vld [vmem:[#allocation2 + $0x70] sm:$0xff]   ;;  %v308_v15 = vld [vmem:[#allocation2 + $0x78] sm:$0xff]  }
  0x18   :  { %v305_v12 = vld [vmem:[#allocation2 + $0x28] sm:$0xff]   ;;  %202 = vmatprep.mubr.bf16.mxu0 %v312_v11  ;;  %v307_v14 = vld [vmem:[#allocation2 + $0x30] sm:$0xff]   ;;  %v309_v16 = vld [vmem:[#allocation2 + $0x38] sm:$0xff]  }
  0x19   :  { %269 = vmatpush3.bf16.msra.mxu0 %v297_v3  ;;  %v310_v17 = vld [vmem:[%s423_s0] ss:$8 sps:$4 sm:$0xff]   ;;  %s364_s0 = smov [#allocation5]  }
  0x1a   :  { %270 = vmatprep.subr.bf16.mxu0 %v298_v4  ;;  %v264_v20 = vld [vmem:[%s425_s2] ss:$0 sm:$0xff]  ;;  %v265_v23 = vld [vmem:[%s425_s2 + $0x1] ss:$0 sm:$0xff]  ;;  %s234_s6 = sshll.u32 %s364_s0, 4  ;;  %s235_s6 = int_to_ptr.vmem [resolvable:$true] %s234_s6 }
  0x1b   :  { %s335_s7 = scalar_lea.vmem %s235_s6, 256  ;;  %p340_p9 = scmp.lt.s32.totalorder %s235_s6, %s235_s6 }
  0x1c   :  { %p336_p8 = scmp.ne.s32.totalorder %s235_s6, %s335_s7  ;;  %p341_p10 = scmp.lt.s32.totalorder %s335_s7, %s335_s7 }
  0x1d   :  { %271 = vmatpush3.bf16.msra.mxu0 %v299_v5 }
  0x1e   :  { %272 = vmatprep.subr.bf16.mxu0 %v300_v6  ;;  %p342_p11 = por %p341_p10, %p340_p9 }
  0x20   :  { %p343_p12 = pnand %p342_p11, %p336_p8 }
  0x21   :  { %273 = vmatpush3.bf16.msra.mxu0 %v301_v7 }
  0x22   :  { %274 = vmatprep.subr.bf16.mxu0 %v302_v8 }
  0x25   :  { %275 = vmatpush3.bf16.msra.mxu0 %v303_v9 }
  0x26   :  { %276 = vmatprep.subr.bf16.mxu0 %v304_v10 }
  0x29   :  { %277 = vmatpush3.bf16.msra.mxu0 %v305_v12 }
  0x2a   :  { %278 = vmatprep.subr.bf16.mxu0 %v306_v13 }
  0x2d   :  { %279 = vmatpush3.bf16.msra.mxu0 %v307_v14 }
  0x2e   :  { %280 = vmatprep.subr.bf16.mxu0 %v308_v15 }
  0x31   :  { %281 = vmatpush3.bf16.msra.mxu0 %v309_v16 }
  0x34   :  { %203 = vmatmul.mubr.bf16.vlgmr.msra.gmra.mrb[0].mxu0 %v310_v17 }
 0x107   :  { %v282_v18 = vpop.f32.mrb[0].mxu0 }
 0x108   :  { %v283_v19 = vpop.f32.mrb[1].mxu0 }
 0x109   :  { %v284_v21 = vadd.f32 %v283_v19, %v282_v18  ;;  %v285_v22 = vpop.f32.mrb[2].mxu0 }
 0x10a   :  { %v286_v24 = vpop.f32.mrb[3].mxu0 }
 0x10b   :  { %v217_v25 = vmul.f32 %v284_v21, %v264_v20  ;;  %v287_v26 = vadd.f32 %v286_v24, %v285_v22 }
 0x10d   :  { %v223_v27 = vadd.f32 %v265_v23, %v217_v25  ;;  %v218_v28 = vmul.f32 %v287_v26, %v264_v20 }
 0x10f   :  { %v225_v29 = vmax.f32 %v223_v27, 0.0  ;;  %v224_v30 = vadd.f32 %v265_v23, %v218_v28 }
 0x111   :  { %227 = vst [vmem:[#allocation5] sm:$0xff] %v225_v29  ;;  %v226_v31 = vmax.f32 %v224_v30, 0.0 }
 0x113   :  { %228 = vst [vmem:[#allocation5 + $0x8] sm:$0xff] %v226_v31 }
 0x114   :  { %346 = shalt.err (!%p343_p12)
}
 0x115   :  { %s347_s9 = scalar_lea.hbm %s426_s3, 256 }
 0x116   :  { %p348_p13 = scmp.ne.s32.totalorder %s426_s3, %s347_s9  ;;  %p351_p0 = scmp.lt.u32.totalorder %s347_s9, %s426_s3 }
 0x118   :  { %p353_p1 = pnand %p351_p0, %p348_p13 }
 0x11a   :  { %356 = shalt.err (!%p353_p1)
}
 0x11b   :  { %s365_s14 = smov 128   ;;  %s366_s15 = smov 8  }
 0x11c   :  { %240 = dma.vmem_to_hbm [thread:$0]  %s235_s6, 256, %s426_s3, [#allocation4], %s365_s14, %s365_s14, %s366_s15  }
 0x11d   :  { %359 = dma.done.wait [#allocation4], 256  }
 0x11e   :  { %360 = vsyncadd [#allocation4], 4294967040 }
 0x11f   :  { %244 = vsyncpa [#allocation3], 1 }
 0x120   :  { %245 = vsyncpa [#allocation4], 1 }

</bundles_post_ra>
